<compile_context>
chip_gen: v5e
topology: v5e:2x2
jax: 0.10.0
libtpu: 0.0.40
codegen_flags: <defaults>
</compile_context>

<pallas_src>
import jax
import jax.numpy as jnp
from jax.experimental import pallas as pl
from jax.experimental.pallas import tpu as pltpu


def _nomic_encoder_kernel(x_ref, m_ref, w_ref, b_ref, tok_ref, pooled_ref,
                          xsum_ref, denom_ref):
    """One (batch, seq-tile) grid step.

    Block views (batch dim squeezed away):
      x_ref      (TS, Hin)   bf16  input token features
      m_ref      (1, TS)     int32 attention mask, lane-dense
      w_ref      (Hin, Hout) bf16  token-encoder weight (VMEM resident)
      b_ref      (1, Hout)   f32   token-encoder bias   (VMEM resident)
      tok_ref    (TS, Hout)  f32   token embeddings (last_hidden_state)
      pooled_ref (1, Hout)   f32   sentence embedding, output-resident over seq
      xsum_ref   (1, Hin)    f32   scratch: sum_s mask_s * x_s
      denom_ref  (1, 1)      f32   scratch: sum_s mask_s
    """
    si = pl.program_id(1)

    @pl.when(si == 0)
    def _init():
        xsum_ref[...] = jnp.zeros_like(xsum_ref)
        denom_ref[...] = jnp.zeros_like(denom_ref)

    x = x_ref[...]                      # (TS, Hin)  bf16
    w = w_ref[...]                      # (Hin, Hout) bf16

    # Hot path 1: token encoder on the MXU — bf16 operands, f32 accumulation.
    tok = jnp.dot(x, w, preferred_element_type=jnp.float32) + b_ref[...]
    tok_ref[...] = tok.astype(tok_ref.dtype)

    # Hot path 2: masked mean pooling, reassociated onto the MXU:
    #   sum_s m_s * tok_s = (sum_s m_s x_s) @ W + (sum_s m_s) * b
    # Per tile only a lane-dense (1,TS)@(TS,Hin) bf16 dot is needed (mask is
    # 0/1, so every product is exact; accumulation stays f32).
    m_f32 = m_ref[...].astype(jnp.float32)                        # (1, TS)
    xsum_ref[...] += jnp.dot(m_f32.astype(jnp.bfloat16), x,
                             preferred_element_type=jnp.float32)  # (1, Hin)
    denom_ref[...] += jnp.sum(m_f32, keepdims=True)               # (1, 1)

    @pl.when(si == pl.num_programs(1) - 1)
    def _finalize():
        # Once per batch element: finish the pooled contraction in f32 on the
        # VPU (keeps pooler_output at full f32 accuracy), then L2-normalize.
        wf = w.astype(jnp.float32)                                # (Hin, Hout)
        xsum_col = jnp.transpose(xsum_ref[...], (1, 0))           # (Hin, 1)
        summed = jnp.sum(xsum_col * wf, axis=0, keepdims=True)    # (1, Hout)
        denom = denom_ref[...]                                    # (1, 1)
        summed = summed + denom * b_ref[...]                      # + (sum m)*b

        # SentenceTransformer mean pooling: clamp denom at 1e-9.
        inv_denom = pl.reciprocal(jnp.maximum(denom, jnp.float32(1e-9)),
                                  approx=False)
        mean = summed * inv_denom                                 # (1, Hout)

        # Normalize module: torch F.normalize semantics, eps = 1e-12.
        norm = jnp.sqrt(jnp.sum(mean * mean, axis=-1, keepdims=True))
        pooled = mean / jnp.maximum(norm, jnp.float32(1e-12))
        pooled_ref[...] = pooled.astype(pooled_ref.dtype)


def _choose_seq_tile(seq_len: int) -> int:
    """Sequence tile: bounds VMEM (v7x has 64 MiB, v5e's default scoped limit
    is 16 MiB) and deepens the pipeline.  TS must keep every block on the
    (8,128) tiling grid: a multiple of 128 (the mask block is (1, TS)) unless
    it equals the full sequence length."""
    if seq_len <= 512:
        return seq_len
    for ts in (512, 256, 128):
        if seq_len % ts == 0:
            return ts
    return seq_len  # fall back to an untiled sequence axis


def nomic_forward(input_embeds, attention_mask, w, b, *, seq_tile=None):
    """Pallas implementation of NomicAIWrapper.forward.

    Returns a BaseModelOutputWithPooling-like dict:
      last_hidden_state = token embeddings            [B, S, Hout] (f32)
      pooler_output     = sentence embedding          [B, Hout]    (f32)
      attentions        = attention_mask pass-through [B, S]
    """
    B, S, Hin = input_embeds.shape
    Hout = w.shape[1]
    ts = seq_tile if seq_tile is not None else _choose_seq_tile(S)
    assert S % ts == 0, "sequence length must be divisible by the seq tile"
    num_s = S // ts

    # bf16 MXU operands; f32 accumulation happens inside the kernel.
    x_bf16 = input_embeds.astype(jnp.bfloat16)
    w_bf16 = w.astype(jnp.bfloat16)
    b_f32 = b.astype(jnp.float32).reshape(1, Hout)
    # Lane-dense int mask: no extra f32 mask array in HBM; cast in-kernel.
    mask_row = attention_mask.astype(jnp.int32).reshape(B, 1, S)

    cost = pl.CostEstimate(
        flops=(2 * B * S * Hin * Hout          # token encoder
               + 2 * B * S * Hin               # per-tile masked x-sum
               + 2 * B * Hin * Hout),          # finalize pooled contraction
        transcendentals=0,
        bytes_accessed=(x_bf16.size * 2 + w_bf16.size * 2 + b_f32.size * 4
                        + mask_row.size * 4
                        + B * S * Hout * 4 + B * Hout * 4),
    )

    tok, pooled = pl.pallas_call(
        _nomic_encoder_kernel,
        out_shape=(
            jax.ShapeDtypeStruct((B, S, Hout), jnp.float32),
            jax.ShapeDtypeStruct((B, 1, Hout), jnp.float32),
        ),
        grid_spec=pltpu.PrefetchScalarGridSpec(
            num_scalar_prefetch=0,
            grid=(B, num_s),
            in_specs=[
                pl.BlockSpec((pl.Squeezed(), ts, Hin),
                             lambda bi, si: (bi, si, 0)),
                pl.BlockSpec((pl.Squeezed(), 1, ts),
                             lambda bi, si: (bi, 0, si)),
                pl.BlockSpec((Hin, Hout), lambda bi, si: (0, 0)),
                pl.BlockSpec((1, Hout), lambda bi, si: (0, 0)),
            ],
            out_specs=[
                pl.BlockSpec((pl.Squeezed(), ts, Hout),
                             lambda bi, si: (bi, si, 0)),
                pl.BlockSpec((pl.Squeezed(), 1, Hout),
                             lambda bi, si: (bi, 0, 0)),
            ],
            scratch_shapes=[
                pltpu.VMEM((1, Hin), jnp.float32),   # masked x-sum accumulator
                pltpu.VMEM((1, 1), jnp.float32),     # mask denominator
            ],
        ),
        compiler_params=pltpu.CompilerParams(
            # Batch shards across TensorCores (v7x megacore); the seq axis
            # carries the resident pooled accumulator so it is "arbitrary".
            dimension_semantics=("parallel", "arbitrary"),
        ),
        cost_estimate=cost,
    )(x_bf16, mask_row, w_bf16, b_f32)

    return {
        "last_hidden_state": tok,                   # token_embeddings
        "pooler_output": pooled.reshape(B, Hout),   # sentence_embedding
        "attentions": attention_mask,               # attention_mask
    }


def _reference(input_embeds, attention_mask, w, b):
    # Mirror the kernel's bf16 operand rounding; accumulation stays f32.
    x = input_embeds.astype(jnp.bfloat16).astype(jnp.float32)
    wf = w.astype(jnp.bfloat16).astype(jnp.float32)
    tok = jnp.einsum("bsh,hd->bsd", x, wf) + b.reshape(1, 1, -1)
    m = attention_mask.astype(jnp.float32)[..., None]
    mean = jnp.sum(tok * m, axis=1) / jnp.maximum(jnp.sum(m, axis=1), 1e-9)
    norm = jnp.sqrt(jnp.sum(mean * mean, axis=-1, keepdims=True))
    pooled = mean / jnp.maximum(norm, 1e-12)
    return tok, pooled


if __name__ == "__main__":
    B, S, Hin, Hout = 2, 8, 32, 32

    key = jax.random.PRNGKey(0)
    k_x, k_w, k_b = jax.random.split(key, 3)

    input_embeds = jax.random.normal(k_x, (B, S, Hin), dtype=jnp.float32)
    # mask out the tail of the second sequence to exercise masked pooling
    attention_mask = jnp.array(
        [[1] * S, [1] * (S - 3) + [0] * 3], dtype=jnp.int32
    )
    w = jax.random.normal(k_w, (Hin, Hout), dtype=jnp.float32) * 0.05
    b = jax.random.normal(k_b, (1, Hout), dtype=jnp.float32) * 0.01

    out = nomic_forward(input_embeds, attention_mask, w, b)
    jax.block_until_ready(out)

    ref_tok, ref_pooled = _reference(input_embeds, attention_mask, w, b)
    assert jnp.allclose(out["last_hidden_state"], ref_tok, atol=5e-5, rtol=5e-5)
    assert jnp.allclose(out["pooler_output"], ref_pooled, atol=5e-5, rtol=5e-5)
    assert out["attentions"].shape == (B, S)

    print("KERNEL_OK")
</pallas_src>

<mosaic_0001>
module attributes {stable_mosaic.version = 11 : i64} {
  func.func @_nomic_encoder_kernel(%arg0: i32, %arg1: i32, %arg2: memref<1x8x32xbf16, #tpu.memory_space<vmem>>, %arg3: memref<1x1x8xi32, #tpu.memory_space<vmem>>, %arg4: memref<32x32xbf16, #tpu.memory_space<vmem>>, %arg5: memref<1x32xf32, #tpu.memory_space<vmem>>, %arg6: memref<1x8x32xf32, #tpu.memory_space<vmem>>, %arg7: memref<1x1x32xf32, #tpu.memory_space<vmem>>, %arg8: memref<1x32xf32, #tpu.memory_space<vmem>>, %arg9: memref<1x1xf32, #tpu.memory_space<vmem>>) attributes {dimension_semantics = [#tpu.dimension_semantics<parallel>, #tpu.dimension_semantics<arbitrary>], iteration_bounds = array<i64: 2, 1>, scalar_prefetch = 0 : i64, scratch_operands = 2 : i64, tpu.core_type = #tpu.core_type<tc>, window_params = [{transform_indices = @transform_0, window_bounds = array<i64: 1, 8, 32>}, {transform_indices = @transform_1, window_bounds = array<i64: 1, 1, 8>}, {pipeline_mode = #tpu.pipeline_mode<synchronous>, transform_indices = @transform_2, window_bounds = array<i64: 32, 32>}, {pipeline_mode = #tpu.pipeline_mode<synchronous>, transform_indices = @transform_3, window_bounds = array<i64: 1, 32>}, {transform_indices = @transform_4, window_bounds = array<i64: 1, 8, 32>}, {transform_indices = @transform_5, window_bounds = array<i64: 1, 1, 32>}]} {
    %c0_i32 = arith.constant 0 : i32
    %0 = arith.cmpi eq, %arg1, %c0_i32 : i32
    %1 = arith.extui %0 : i1 to i32
    %c0_i32_0 = arith.constant 0 : i32
    %2 = arith.cmpi ne, %1, %c0_i32_0 : i32
    scf.if %2 {
      %cst_25 = arith.constant 0.000000e+00 : f32
      %32 = vector.broadcast %cst_25 : f32 to vector<1x32xf32>
      %c0_26 = arith.constant 0 : index
      %c0_27 = arith.constant 0 : index
      %33 = vector.load %arg8[%c0_26, %c0_27] : memref<1x32xf32, #tpu.memory_space<vmem>>, vector<1x32xf32>
      tpu.vector_store %arg8[%c0_26, %c0_27], %32 {strides = array<i32>} : memref<1x32xf32, #tpu.memory_space<vmem>>, vector<1x32xf32>,
      %cst_28 = arith.constant 0.000000e+00 : f32
      %34 = vector.broadcast %cst_28 : f32 to vector<1x1xf32>
      %c0_29 = arith.constant 0 : index
      %c0_30 = arith.constant 0 : index
      %35 = vector.load %arg9[%c0_29, %c0_30] : memref<1x1xf32, #tpu.memory_space<vmem>>, vector<1x1xf32>
      tpu.vector_store %arg9[%c0_29, %c0_30], %34 {strides = array<i32>} : memref<1x1xf32, #tpu.memory_space<vmem>>, vector<1x1xf32>,
    } else {
    }
    %c0 = arith.constant 0 : index
    %c0_1 = arith.constant 0 : index
    %c0_2 = arith.constant 0 : index
    %3 = vector.load %arg2[%c0, %c0_1, %c0_2] : memref<1x8x32xbf16, #tpu.memory_space<vmem>>, vector<1x8x32xbf16>
    %4 = vector.shape_cast %3 : vector<1x8x32xbf16> to vector<8x32xbf16>
    %c0_3 = arith.constant 0 : index
    %c0_4 = arith.constant 0 : index
    %5 = vector.load %arg4[%c0_3, %c0_4] : memref<32x32xbf16, #tpu.memory_space<vmem>>, vector<32x32xbf16>
    %cst = arith.constant dense<0.000000e+00> : vector<8x32xf32>
    %6 = tpu.matmul %4, %5, %cst {dimension_numbers = #tpu.dot_dimension_numbers<[1], [0], [0], [1], [0, 0, 1, 1], [], []>} : vector<8x32xbf16>, vector<32x32xbf16>, vector<8x32xf32> -> vector<8x32xf32>
    %c0_5 = arith.constant 0 : index
    %c0_6 = arith.constant 0 : index
    %7 = vector.load %arg5[%c0_5, %c0_6] : memref<1x32xf32, #tpu.memory_space<vmem>>, vector<1x32xf32>
    %8 = vector.broadcast %7 : vector<1x32xf32> to vector<8x32xf32>
    %9 = arith.addf %6, %8 : vector<8x32xf32>
    %c0_7 = arith.constant 0 : index
    %c0_8 = arith.constant 0 : index
    %c0_9 = arith.constant 0 : index
    %10 = vector.load %arg6[%c0_7, %c0_8, %c0_9] : memref<1x8x32xf32, #tpu.memory_space<vmem>>, vector<1x8x32xf32>
    %11 = vector.shape_cast %10 : vector<1x8x32xf32> to vector<8x32xf32>
    %12 = vector.shape_cast %9 : vector<8x32xf32> to vector<1x8x32xf32>
    tpu.vector_store %arg6[%c0_7, %c0_8, %c0_9], %12 {strides = array<i32>} : memref<1x8x32xf32, #tpu.memory_space<vmem>>, vector<1x8x32xf32>,
    %c0_10 = arith.constant 0 : index
    %c0_11 = arith.constant 0 : index
    %c0_12 = arith.constant 0 : index
    %13 = vector.load %arg3[%c0_10, %c0_11, %c0_12] : memref<1x1x8xi32, #tpu.memory_space<vmem>>, vector<1x1x8xi32>
    %14 = vector.shape_cast %13 : vector<1x1x8xi32> to vector<1x8xi32>
    %15 = arith.sitofp %14 : vector<1x8xi32> to vector<1x8xf32>
    %c0_13 = arith.constant 0 : index
    %c0_14 = arith.constant 0 : index
    %16 = vector.load %arg8[%c0_13, %c0_14] : memref<1x32xf32, #tpu.memory_space<vmem>>, vector<1x32xf32>
    %17 = arith.truncf %15 : vector<1x8xf32> to vector<1x8xbf16>
    %cst_15 = arith.constant dense<0.000000e+00> : vector<1x32xf32>
    %18 = tpu.matmul %17, %4, %cst_15 {dimension_numbers = #tpu.dot_dimension_numbers<[1], [0], [0], [1], [0, 0, 1, 1], [], []>} : vector<1x8xbf16>, vector<8x32xbf16>, vector<1x32xf32> -> vector<1x32xf32>
    %19 = arith.addf %16, %18 : vector<1x32xf32>
    %c0_16 = arith.constant 0 : index
    %c0_17 = arith.constant 0 : index
    %20 = vector.load %arg8[%c0_16, %c0_17] : memref<1x32xf32, #tpu.memory_space<vmem>>, vector<1x32xf32>
    tpu.vector_store %arg8[%c0_16, %c0_17], %19 {strides = array<i32>} : memref<1x32xf32, #tpu.memory_space<vmem>>, vector<1x32xf32>,
    %c0_18 = arith.constant 0 : index
    %c0_19 = arith.constant 0 : index
    %21 = vector.load %arg9[%c0_18, %c0_19] : memref<1x1xf32, #tpu.memory_space<vmem>>, vector<1x1xf32>
    %22 = vector.shape_cast %15 : vector<1x8xf32> to vector<1x1x8xf32>
    %cst_20 = arith.constant dense<0.000000e+00> : vector<1xf32>
    %23 = vector.multi_reduction <add>, %22, %cst_20 [1, 2] : vector<1x1x8xf32> to vector<1xf32>
    %24 = vector.shape_cast %23 : vector<1xf32> to vector<1x1x1xf32>
    %25 = vector.extract %24[0, 0, 0] : f32 from vector<1x1x1xf32>
    %26 = vector.broadcast %25 : f32 to vector<1x1xf32>
    %27 = arith.addf %21, %26 : vector<1x1xf32>
    %c0_21 = arith.constant 0 : index
    %c0_22 = arith.constant 0 : index
    %28 = vector.load %arg9[%c0_21, %c0_22] : memref<1x1xf32, #tpu.memory_space<vmem>>, vector<1x1xf32>
    tpu.vector_store %arg9[%c0_21, %c0_22], %27 {strides = array<i32>} : memref<1x1xf32, #tpu.memory_space<vmem>>, vector<1x1xf32>,
    %c0_i32_23 = arith.constant 0 : i32
    %29 = arith.cmpi eq, %arg1, %c0_i32_23 : i32
    %30 = arith.extui %29 : i1 to i32
    %c0_i32_24 = arith.constant 0 : i32
    %31 = arith.cmpi ne, %30, %c0_i32_24 : i32
    scf.if %31 {
      %32 = arith.extf %5 : vector<32x32xbf16> to vector<32x32xf32>
      %c0_25 = arith.constant 0 : index
      %c0_26 = arith.constant 0 : index
      %33 = vector.load %arg8[%c0_25, %c0_26] : memref<1x32xf32, #tpu.memory_space<vmem>>, vector<1x32xf32>
      %34 = tpu.transpose %33, [1, 0] : vector<1x32xf32> -> vector<32x1xf32>
      %35 = vector.broadcast %34 : vector<32x1xf32> to vector<32x32xf32>
      %36 = arith.mulf %35, %32 : vector<32x32xf32>
      %cst_27 = arith.constant dense<0.000000e+00> : vector<32xf32>
      %37 = vector.multi_reduction <add>, %36, %cst_27 [0] : vector<32x32xf32> to vector<32xf32>
      %38 = vector.shape_cast %37 : vector<32xf32> to vector<1x32xf32>
      %c0_28 = arith.constant 0 : index
      %c0_29 = arith.constant 0 : index
      %39 = vector.load %arg9[%c0_28, %c0_29] : memref<1x1xf32, #tpu.memory_space<vmem>>, vector<1x1xf32>
      %c0_30 = arith.constant 0 : index
      %c0_31 = arith.constant 0 : index
      %40 = vector.load %arg5[%c0_30, %c0_31] : memref<1x32xf32, #tpu.memory_space<vmem>>, vector<1x32xf32>
      %41 = vector.broadcast %39 : vector<1x1xf32> to vector<1x32xf32>
      %42 = arith.mulf %41, %40 : vector<1x32xf32>
      %43 = arith.addf %38, %42 : vector<1x32xf32>
      %cst_32 = arith.constant 9.99999971E-10 : f32
      %44 = vector.broadcast %cst_32 : f32 to vector<1x1xf32>
      %45 = arith.maximumf %39, %44 : vector<1x1xf32>
      %46 = tpu.reciprocal %45 : vector<1x1xf32> -> vector<1x1xf32>
      %47 = vector.broadcast %46 : vector<1x1xf32> to vector<1x32xf32>
      %48 = arith.mulf %43, %47 : vector<1x32xf32>
      %49 = arith.mulf %48, %48 : vector<1x32xf32>
      %cst_33 = arith.constant dense<0.000000e+00> : vector<1xf32>
      %50 = vector.multi_reduction <add>, %49, %cst_33 [1] : vector<1x32xf32> to vector<1xf32>
      %51 = vector.shape_cast %50 : vector<1xf32> to vector<1x1xf32>
      %52 = math.sqrt %51 : vector<1x1xf32>
      %cst_34 = arith.constant 9.99999996E-13 : f32
      %53 = vector.broadcast %cst_34 : f32 to vector<1x1xf32>
      %54 = arith.maximumf %52, %53 : vector<1x1xf32>
      %55 = vector.broadcast %54 : vector<1x1xf32> to vector<1x32xf32>
      %56 = arith.divf %48, %55 : vector<1x32xf32>
      %c0_35 = arith.constant 0 : index
      %c0_36 = arith.constant 0 : index
      %c0_37 = arith.constant 0 : index
      %57 = vector.load %arg7[%c0_35, %c0_36, %c0_37] : memref<1x1x32xf32, #tpu.memory_space<vmem>>, vector<1x1x32xf32>
      %58 = vector.shape_cast %57 : vector<1x1x32xf32> to vector<1x32xf32>
      %59 = vector.shape_cast %56 : vector<1x32xf32> to vector<1x1x32xf32>
      tpu.vector_store %arg7[%c0_35, %c0_36, %c0_37], %59 {strides = array<i32>} : memref<1x1x32xf32, #tpu.memory_space<vmem>>, vector<1x1x32xf32>,
    } else {
    }
    return
  }
  func.func @transform_0(%arg0: i32, %arg1: i32) -> (i32, i32, i32) {
    %c0_i32 = arith.constant 0 : i32
    %c0_i32_0 = arith.constant 0 : i32
    return %arg0, %arg1, %c0_i32 : i32, i32, i32
  }
  func.func @transform_1(%arg0: i32, %arg1: i32) -> (i32, i32, i32) {
    %c0_i32 = arith.constant 0 : i32
    %c0_i32_0 = arith.constant 0 : i32
    return %arg0, %c0_i32, %arg1 : i32, i32, i32
  }
  func.func @transform_2(%arg0: i32, %arg1: i32) -> (i32, i32) {
    %c0_i32 = arith.constant 0 : i32
    %c0_i32_0 = arith.constant 0 : i32
    %c0_i32_1 = arith.constant 0 : i32
    return %c0_i32, %c0_i32_0 : i32, i32
  }
  func.func @transform_3(%arg0: i32, %arg1: i32) -> (i32, i32) {
    %c0_i32 = arith.constant 0 : i32
    %c0_i32_0 = arith.constant 0 : i32
    %c0_i32_1 = arith.constant 0 : i32
    return %c0_i32, %c0_i32_0 : i32, i32
  }
  func.func @transform_4(%arg0: i32, %arg1: i32) -> (i32, i32, i32) {
    %c0_i32 = arith.constant 0 : i32
    %c0_i32_0 = arith.constant 0 : i32
    return %arg0, %arg1, %c0_i32 : i32, i32, i32
  }
  func.func @transform_5(%arg0: i32, %arg1: i32) -> (i32, i32, i32) {
    %c0_i32 = arith.constant 0 : i32
    %c0_i32_0 = arith.constant 0 : i32
    %c0_i32_1 = arith.constant 0 : i32
    return %arg0, %c0_i32, %c0_i32_0 : i32, i32, i32
  }
}

</mosaic_0001>

<bundles_post_ra>
// kernel: tpu_custom_call.1
= control target key start
LH: loop header
LB: loop body
LE: loop exit
PB: predicated region body
PF: predicated region fallthrough
CT: control target
= control target key end

     0   :  { %s1300_s0 = inlined_call_operand.hbm [shape: bf16[2,8,32], index: 0, kind: input, shape index: {}]   ;;  %s1301_s1 = inlined_call_operand.hbm [shape: s32[2,1,8], index: 1, kind: input, shape index: {}]   ;;  %s1302_s2 = inlined_call_operand.hbm [shape: bf16[32,32], index: 2, kind: input, shape index: {}]   ;;  %s1303_s3 = inlined_call_operand.vmem [shape: f32[1,32], index: 3, kind: input, shape index: {}]   ;;  %s1304_s4 = inlined_call_operand.hbm [shape: f32[2,8,32], index: 4, kind: output, shape index: {0}]   ;;  %s1305_s5 = inlined_call_operand.hbm [shape: f32[2,1,32], index: 5, kind: output, shape index: {1}]  }
   0x1   :  { %1310 = sst [smem:[#allocation23_spill]] %s1302_s2 }
   0x2   :  { %11 = vsyncpa [#allocation5], 0 }
   0x3   :  { %13 = vsyncpa [#allocation5 + $0x1], 0 }
   0x4   :  { %14 = vsyncpa [#allocation8], 0 }
   0x5   :  { %16 = vsyncpa [#allocation8 + $0x1], 0 }
   0x6   :  { %17 = vsyncpa [#allocation6], 0 }
   0x7   :  { %19 = vsyncpa [#allocation6 + $0x1], 0 }
   0x8   :  { %20 = vsyncpa [#allocation12], 0 }
   0x9   :  { %22 = vsyncpa [#allocation12 + $0x1], 0  ;;  %s1102_s18 = smov 0   ;;  %s1104_s19 = smov 0  }
   0xa   :  { %s1106_s20 = smov 0   ;;  %s1108_s21 = smov 0  }
   0xb   :  { %s1110_s22 = smov 0   ;;  %s1112_s23 = smov 0  }
   0xc LB: > { %1311 = sst [smem:[#allocation18_spill]] %s1045_s18  ;;  %s1133_s24 = sadd.s32 4294967295, %s1065_s23   ;;  %s1065_s23 = sphi %s1112_s23, %s28_s23   ;;  %s1061_s22 = sphi %s1110_s22, %s1330_s22   ;;  %s1057_s21 = sphi %s1108_s21, %s1329_s21   ;;  %s1053_s20 = sphi %s1106_s20, %s1325_s20   ;;  %s1049_s19 = sphi %s1104_s19, %s1328_s19   ;;  %s1045_s18 = sphi %s1102_s18, %s1327_s18  }
   0xd   : > { %1312 = sst [smem:[#allocation19_spill]] %s1053_s20  ;;  %p729_p0 = scmp.ge.s32.totalorder %s1065_s23, 1 }
   0xe   : > { %p63_p1 = scmp.eq.s32.totalorder %s1133_s24, 0  ;;  %p197_p2 = scmp.lt.s32.totalorder %s1065_s23, 3 }
   0xf   : > { %s1313_s2 = sld [smem:[#allocation23_spill]]  ;;  %s1067_s29 = smov [#allocation9]  }
  0x10   : > { %p1141_p3 = pnand %p729_p0, %p197_p2  ;;  %s210_s30 = sshll.u32 %s1067_s29, 4  ;;  %s211_s30 = int_to_ptr.vmem [resolvable:$true] %s210_s30 }
  0x11   : > { %p731_p6 = scmp.ge.s32.totalorder %s1065_s23, 2  ;;  %s1068_s6 = smov 64  }
  0x12   : > { %p768_p4 = pneg %p1141_p3  ;;  %s1069_s7 = smov 4  }
  0x13   : > { %s728_s8 = sadd.s32 4294967294, %s1065_s23   ;;  %s40_s9 = sadd.s32 1, %s1061_s22 }
  0x14   : > { %p769_p5 = pnand %p768_p4, %p63_p1  ;;  %s49_s10 = sadd.s32 1, %s1053_s20 }
  0x15   : > { %s208_s27 = sshll.u32 %s1313_s2, 4  ;;  %p42_p7 = scmp.ge.s32.totalorder %s40_s9, 2  ;;  %s209_s27 = int_to_ptr.hbm [resolvable:$true] %s208_s27 }
  0x16   : > { %771 = dma.hbm_to_vmem [thread:$0]  (!%p769_p5), %s209_s27, 256, %s211_s30, [#allocation8], %s1068_s6, %s1068_s6, %s1069_s7  }
  0x17   : > { %p56_p8 = scmp.ne.s32.totalorder %s1053_s20, %s1049_s19  ;;  %p57_p9 = scmp.eq.s32.totalorder %s1065_s23, 0 }
  0x18   : > { %p62_p10 = scmp.ne.s32.totalorder %s1049_s19, %s1045_s18  ;;  %s1332_s9 = smov (%p42_p7, %s40_s9), 0 }
  0x19   : > { %1315 = sst [smem:[#allocation20_spill]] %s1332_s9  ;;  %p1160_p11 = por %p57_p9, %p56_p8 }
  0x1a   : > { %p1166_p12 = por %p63_p1, %p62_p10  ;;  %s44_s13 = ssub.s32 %s1061_s22, %s1332_s9 }
  0x1b   : > { %p158_p13 = scmp.eq.s32.totalorder %s1133_s24, 1  ;;  %p47_p0 = scmp.eq.s32.totalorder %s44_s13, 0 }
  0x1c   : > { %p164_p2 = scmp.eq.s32.totalorder %s728_s8, 1  ;;  %p787_p5 = scmp.lt.s32.totalorder %s1065_s23, 2 }
  0x1d   : > { %p1173_p4 = por %p158_p13, %p56_p8  ;;  %s227_s17 = sand.u32 1, %s1053_s20  }
  0x1e   : > { %s1179_s15 = scalar_select %p47_p0, %s1053_s20, %s49_s10  }
  0x1f   : > { %p1181_p7 = por %p164_p2, %p62_p10  ;;  %s732_s25 = sshll.u32 %s227_s17, 2 }
  0x20   : > { %1319 = sst [smem:[#allocation21_spill]] %s1179_s15  ;;  %s733_s26 = sshll.u32 %s1061_s22, 2 }
  0x21   : > { %s1320_s16 = scalar_select %p1181_p7, 1, 0 }
  0x22   : > { %s236_s30 = scalar_lea.hbm %s1300_s0, %s733_s26  ;;  %s231_s6 = scalar_lea.vmem [#allocation4], %s732_s25 }
  0x23   : > { %1321 = sst [smem:[#allocation22_spill]] %s1320_s16  ;;  %s240_s7 = sshll.u32 %s231_s6, 4  ;;  %s241_s7 = int_to_ptr.vmem [resolvable:$true] %s240_s7 }
  0x24   : > { %s238_s8 = sshll.u32 %s236_s30, 4  ;;  %p773_p8 = pnand %p787_p5, %p1160_p11  ;;  %s239_s8 = int_to_ptr.hbm [resolvable:$true] %s238_s8 }
  0x25   : > { %s247_s10 = sand.u32 1, %s1065_s23   ;;  %s228_s13 = scalar_lea.sflag [#allocation5], %s227_s17 }
  0x26   : > { %775 = dma.hbm_to_vmem [thread:$0]  (!%p773_p8), %s239_s8, 64, %s241_s7, %s228_s13  }
  0x27   : > { %s254_s15 = scalar_lea.hbm %s1301_s1, %s1061_s22  ;;  %s250_s20 = scalar_lea.vmem [#allocation7], %s227_s17 }
  0x28   : > { %s258_s16 = sshll.u32 %s250_s20, 4  ;;  %s256_s18 = sshll.u32 %s254_s15, 4  ;;  %s259_s16 = int_to_ptr.vmem [resolvable:$true] %s258_s16  ;;  %s257_s18 = int_to_ptr.hbm [resolvable:$true] %s256_s18 }
  0x29   : > { %s248_s26 = scalar_lea.sflag [#allocation8], %s247_s10  ;;  %267 = sbr.rel (%p1141_p3) target bundleno = 671 (0x29f), region = 36 }
  0x2a   : > { %778 = dma.hbm_to_vmem [thread:$0]  (!%p773_p8), %s257_s18, 16, %s259_s16, %s248_s26  }
  0x2b   : > { %s1200_s11 = sand.u32 (!%p1141_p3), 1, %s1049_s19  }
  0x2c   : > { %s735_s25 = sshll.u32 (!%p1141_p3), %s1200_s11, 2  ;;  %s270_s27 = scalar_lea.sflag (!%p1141_p3), [#allocation5], %s1200_s11 }
  0x2d   : > { %s273_s2 = scalar_lea.vmem (!%p1141_p3), [#allocation4], %s735_s25 }
  0x2e   : > { %1024 = dma.done.wait (%p1166_p12), %s270_s27, 64  }
  0x2f   : > { %1026 = vsyncadd (%p1166_p12), %s270_s27, 4294967232  ;;  %s279_s18 = sand.u32 1, %s1133_s24   ;;  %s282_s28 = scalar_lea.vmem [#allocation7], %s1200_s11 }
  0x30   : > { %s280_s20 = scalar_lea.sflag [#allocation8], %s279_s18 }
  0x31   : > { %1028 = dma.done.wait (%p1166_p12), %s280_s20, 16  }
  0x32   : > { %1030 = vsyncadd (%p1166_p12), %s280_s20, 4294967280 }
  0x33   : > { %1032 = dma.done.wait (%p63_p1), [#allocation8], 256  }
  0x34   : > { %1034 = vsyncadd (%p63_p1), [#allocation8], 4294967040  ;;  %vm328_vm0 = vcmask 253952   ;;  %v1070_v0 = vmov 0.0   ;;  %vm379_vm1 = vcmask 1043456   ;;  %vm399_vm2 = vcmask 57344  }
  0x35   : > { %329 = vst.msk [vmem:[#allocation2] sm:$0x1] %vm328_vm0, %v1070_v0  ;;  %v1219_v1 = vld [vmem:[%s273_s2] sm:$0xf]  ;;  %v371_v2 = vld [vmem:[%s282_s28] sm:$0x1] }
  0x36   : > { %v380_v3 = vsel %vm379_vm1, %v1219_v1, 0  ;;  %v372_v4 = vcvt.s32.f32 %v371_v2  ;;  %vm375_vm3 = vcmask 64512   ;;  %vm330_vm4 = vcmask 0   ;;  %v333_v40 = vld [vmem:[#allocation9] sm:$0xff]   ;;  %v335_v42 = vld [vmem:[#allocation9 + $0x8] sm:$0xff]   ;;  %s749_s15 = sshll.u32 %s1057_s21, 3 }
  0x37   : > { %389 = vmatpush.bf16.msra.mxu1 %v380_v3  ;;  %331 = vst.msk [vmem:[#allocation3] sm:$0x1] %vm330_vm4, %v1070_v0  ;;  %v1071_v19 = vmov 0   ;;  %v417_v43 = vunpack.c.l.bf16 %v333_v40  ;;  %v419_v44 = vunpack.c.l.bf16 %v335_v42  ;;  %v418_v45 = vunpack.c.h.bf16 %v333_v40  ;;  %v753_v46 = vld [vmem:[#allocation9 + $0x8] sm:$0xff]  ;;  %v752_v49 = vld [vmem:[#allocation9] sm:$0xff]  ;;  %s737_s16 = sshll.u32 %s1200_s11, 3  ;;  %s572_s30 = scalar_lea.hbm %s1304_s4, %s749_s15 }
  0x38   : > { %v374_v5 = vpack.c.bf16 %v372_v4, %v372_v4  ;;  %v400_v6 = vsel %vm399_vm2, %v372_v4, 0.0  ;;  %843 = vset.pattern.permute.xlu1 %v1071_v19  ;;  %844 = vset.pattern.permute.xlu2 %v1071_v19  ;;  %v420_v48 = vunpack.c.h.bf16 %v335_v42  ;;  %vm353_vm9 = vcmask 261120   ;;  %s316_s6 = scalar_lea.vmem [#allocation10], %s737_s16  ;;  %s576_s8 = sshll.u32 %s572_s30, 4  ;;  %s577_s8 = int_to_ptr.hbm [resolvable:$true] %s576_s8 }
  0x39   : > { %401 = vadd.xlane.f32.xlu0 %v400_v6  ;;  %363 = vmatpush.bf16.msra.mxu0 %v753_v46  ;;  %s574_s7 = sshll.u32 %s316_s6, 4  ;;  %s557_s26 = scalar_lea.sflag [#allocation6], %s1200_s11  ;;  %s575_s7 = int_to_ptr.vmem [resolvable:$true] %s574_s7 }
  0x3a   : > { %747 = vmatmul.msk.bf16.vlgmr.msra.gmra.mxu1 %vm375_vm3, %v374_v5  ;;  %v492_v5 = vld [vmem:[%s1303_s3] sm:$0x1]  ;;  %s957_s25 = sshra.s32 %s577_s8, 4  ;;  %s963_s20 = scalar_lea.hbm %s1304_s4, 16  ;;  %s958_s25 = int_to_ptr.hbm [resolvable:$true] %s957_s25 }
  0x3b   : > { %s959_s27 = scalar_lea.hbm %s958_s25, 8  ;;  %p964_p10 = scmp.lt.s32.totalorder %s958_s25, %s1304_s4 }
  0x3c   : > { %v373_v12 = vld [vmem:[#allocation2] sm:$0x1]  ;;  %p960_p1 = scmp.ne.s32.totalorder %s958_s25, %s959_s27  ;;  %p965_p11 = scmp.lt.s32.totalorder %s963_s20, %s959_s27 }
  0x3d   : > { %364 = vmatpush.bf16.msra.mxu0 %v752_v49 }
  0x3e   : > { %v398_v20 = vld [vmem:[#allocation3] sm:$0x1]  ;;  %p961_p3 = pnand %p960_p1, %p1173_p4  ;;  %p966_p12 = por %p965_p11, %p964_p10 }
  0x40   : > { %746 = vmatmul.msk.bf16.vlgmr.msra.gmra.mxu0 %vm353_vm9, %v1219_v1  ;;  %p962_p9 = pneg %p961_p3 }
  0x42   : > { %p967_p13 = pnand %p966_p12, %p962_p9 }
  0xac   : > { %v402_v7 = vpop.xlane.xlu0 %401 }
  0xad   : > { %v403_v8 = vrot.slane %v402_v7, 4 }
  0xaf   : > { %v404_v9 = vadd.f32 %v403_v8, %v402_v7 }
  0xb1   : > { %v405_v10 = vrot.slane %v404_v9, 2 }
  0xb3   : > { %v406_v11 = vadd.f32 %v405_v10, %v404_v9 }
  0xb5   : > { %v407_v13 = vrot.slane %v406_v11, 1 }
  0xb7   : > { %v391_v14 = vpop.f32.mrf.mxu1  ;;  %v408_v15 = vadd.f32 %v407_v13, %v406_v11 }
  0xb8   : > { %v395_v16 = vadd.f32 %v391_v14, %v373_v12  ;;  %v846_v14 = vld [vmem:[%s1303_s3] ss:$0 sm:$0xff] }
  0xb9   : > { %754 = vpush %v408_v15 }
  0xba   : > { %397 = vst.msk [vmem:[#allocation2] sm:$0x1] %vm328_vm0, %v395_v16 }
  0xbd   : > { %v366_v15 = vpop.f32.mrf.mxu0 }
  0xbe   : > { %v367_v16 = vadd.f32 %v846_v14, %v366_v15 }
  0xbf   : > { %v393_v17 = vpop.f32.mrf.mxu1 }
  0xc0   : > { %370 = vst.msk [vmem:[%s316_s6] sm:$0xff] %vm353_vm9, %v367_v16 }
  0xc1   : > { %v421_v18 = vld [vmem:[#allocation2] sm:$0x1] }
  0xc2   : > { %422 = vxpose.xlu0.b32.start.end [1/1] (short) (narrow) %v421_v18, 32 }
  0xea   : > { %s755_s24 = spop %754 }
  0xeb   : > { %v410_v21 = vstv %s755_s24 }
  0xec   : > { %v411_v22 = vadd.f32 %v410_v21, %v398_v20 }
  0xee   : > { %413 = vst.msk [vmem:[#allocation3] sm:$0x1] %vm330_vm4, %v411_v22 }
  0xf5   : > { %v491_v23 = vld [vmem:[#allocation3] sm:$0x1] }
  0xf6   : > { %v501_v25 = vmax.f32 %v491_v23, 1e-09 }
  0xf8   : > { %847 = vrcp.f32 %v501_v25  ;;  %vm507_vm5 = vweird.f32 %v501_v25  ;;  %v513_v33 = vand.u32 2147483648, %v501_v25  ;;  %v511_v35 = vand.u32 2147483647, %v501_v25 }
  0xfa   : > { %v514_v36 = vor.u32 1.1754944e-38, %v513_v33  ;;  %vm512_vm8 = vcmp.eq.f32.partialorder %v511_v35, 8.507059e+37 }
  0xfe   : > { %v848_v27 = vpop.eup %847 }
  0xff   : > { %v503_v28 = vmul.f32 %v848_v27, %v501_v25  ;;  %vm508_vm6 = vweird.f32 %v848_v27 }
 0x100   : > { %vm509_vm7 = vmor %vm507_vm5, %vm508_vm6 }
 0x101   : > { %v504_v30 = vsub.f32 1.0, %v503_v28 }
 0x103   : > { %v505_v31 = vmul.f32 %v848_v27, %v504_v30 }
 0x105   : > { %v506_v34 = vadd.f32 %v848_v27, %v505_v31 }
 0x107   : > { %v510_v37 = vsel %vm509_vm7, %v848_v27, %v506_v34 }
 0x108   : > { %v515_v38 = vsel %vm512_vm8, %v514_v36, %v510_v37 }
 0x129   : > { %845 = vset.pattern.permute.xlu0 %v1071_v19 }
 0x166   : > { %v438_v24 = vpop.trf.xlu0 }
 0x167   : > { %456 = vperm.xlu1 %843, %v438_v24  }
 0x16e   : > { %v439_v26 = vpop.trf.xlu0 }
 0x16f   : > { %461 = vperm.xlu1 %843, %v439_v26  }
 0x176   : > { %v440_v29 = vpop.trf.xlu0 }
 0x177   : > { %495 = vperm.xlu1 %843, %v491_v23   ;;  %466 = vperm.xlu2 %844, %v440_v29  }
 0x17e   : > { %v441_v32 = vpop.trf.xlu0 }
 0x17f   : > { %471 = vperm.xlu2 %844, %v441_v32  }
 0x187   : > { %518 = vperm.xlu2 %844, %v515_v38  }
 0x1d1   : > { %v467_v39 = vpop.permute.xlu2 %466 }
 0x1d2   : > { %v476_v51 = vmul.f32 %v467_v39, %v419_v44 }
 0x1d4   : > { %v481_v58 = vsel %vm353_vm9, %v476_v51, 0.0 }
 0x1d9   : > { %v457_v41 = vpop.permute.xlu1 %456  ;;  %v472_v53 = vpop.permute.xlu2 %471 }
 0x1da   : > { %v474_v47 = vmul.f32 %v457_v41, %v417_v43  ;;  %v477_v55 = vmul.f32 %v472_v53, %v420_v48 }
 0x1dc   : > { %v478_v54 = vsel %vm353_vm9, %v474_v47, 0.0  ;;  %v483_v60 = vsel %vm353_vm9, %v477_v55, 0.0 }
 0x1e1   : > { %v462_v50 = vpop.permute.xlu1 %461  ;;  %v519_v7 = vpop.permute.xlu2 %518 }
 0x1e2   : > { %v475_v52 = vmul.f32 %v462_v50, %v418_v45  ;;  %v521_v1 = vperm.slane %v519_v7, 0 }
 0x1e4   : > { %v479_v56 = vsel %vm353_vm9, %v475_v52, 0.0 }
 0x1e5   : > { %v480_v57 = vadd.f32 %v479_v56, %v478_v54 }
 0x1e7   : > { %v482_v59 = vadd.f32 %v481_v58, %v480_v57 }
 0x1e9   : > { %v484_v61 = vadd.f32 %v483_v60, %v482_v59  ;;  %v496_v0 = vpop.permute.xlu1 %495 }
 0x1ea   : > { %v498_v4 = vperm.slane %v496_v0, 0 }
 0x1eb   : > { %v485_v62 = vrot.slane %v484_v61, 4 }
 0x1ec   : > { %v499_v9 = vmul.f32 %v498_v4, %v492_v5 }
 0x1ed   : > { %v486_v63 = vadd.f32 %v485_v62, %v484_v61 }
 0x1ef   : > { %v487_v2 = vrot.slane %v486_v63, 2 }
 0x1f1   : > { %v488_v3 = vadd.f32 %v487_v2, %v486_v63 }
 0x1f3   : > { %v489_v6 = vrot.slane %v488_v3, 1 }
 0x1f5   : > { %v490_v8 = vadd.f32 %v489_v6, %v488_v3 }
 0x1f7   : > { %v500_v10 = vadd.f32 %v499_v9, %v490_v8 }
 0x1f9   : > { %v1234_v11 = vmul.f32 %v521_v1, %v500_v10 }
 0x1fb   : > { %v523_v12 = vmul.f32 %v1234_v11, %v1234_v11 }
 0x1fd   : > { %v524_v13 = vsel %vm328_vm0, %v523_v12, 0.0 }
 0x1fe   : > { %525 = vadd.xlane.f32.xlu1 %v524_v13 }
 0x1ff   : > { %970 = shalt.err (!%p967_p13)
}
 0x200   : > { %764 = dma.vmem_to_hbm [thread:$0]  (%p1173_p4), %s575_s7, 128, %s577_s8, %s557_s26   ;;  %v368_v18 = vpop.f32.mrf.mxu0 }
 0x201   : > { %s585_s15 = scalar_lea.hbm %s1305_s5, %s1057_s21  ;;  %s322_s16 = scalar_lea.vmem [#allocation11], %s1200_s11 }
 0x202   : > { %s587_s17 = sshll.u32 %s322_s16, 4  ;;  %s589_s29 = sshll.u32 %s585_s15, 4  ;;  %s588_s17 = int_to_ptr.vmem [resolvable:$true] %s587_s17  ;;  %s590_s29 = int_to_ptr.hbm [resolvable:$true] %s589_s29 }
 0x203   : > { %s562_s30 = scalar_lea.sflag [#allocation12], %s1200_s11  ;;  %s985_s6 = sshra.s32 %s590_s29, 4  ;;  %s986_s6 = int_to_ptr.hbm [resolvable:$true] %s985_s6 }
 0x204   : > { %s987_s21 = scalar_lea.hbm %s986_s6, 1  ;;  %s991_s10 = scalar_lea.hbm %s1305_s5, 2 }
 0x205   : > { %p988_p0 = scmp.ne.s32.totalorder %s986_s6, %s987_s21  ;;  %p992_p8 = scmp.lt.s32.totalorder %s986_s6, %s1305_s5 }
 0x206   : > { %p993_p1 = scmp.lt.s32.totalorder %s991_s10, %s987_s21 }
 0x207   : > { %p989_p2 = pnand %p988_p0, %p1173_p4 }
 0x208   : > { %p994_p3 = por %p993_p1, %p992_p8 }
 0x209   : > { %p990_p5 = pneg %p989_p2 }
 0x20b   : > { %p995_p9 = pnand %p994_p3, %p990_p5 }
 0x271   : > { %v526_v17 = vpop.xlane.xlu1 %525 }
 0x272   : > { %849 = vrsqrt.f32 %v526_v17  ;;  %vm534_vm10 = vcmp.eq.f32.partialorder %v526_v17, inf  ;;  %v537_v26 = vand.u32 2147483648, %v526_v17  ;;  %vm536_vm11 = vcmp.eq.f32.partialorder %v526_v17, 0.0 }
 0x278   : > { %v850_v19 = vpop.eup %849 }
 0x279   : > { %v528_v20 = vmul.f32 %v850_v19, %v526_v17 }
 0x27b   : > { %v529_v21 = vmul.f32 %v850_v19, %v528_v20 }
 0x27d   : > { %v530_v22 = vmul.f32 0.5, %v529_v21 }
 0x27f   : > { %v531_v23 = vsub.f32 1.5, %v530_v22 }
 0x281   : > { %v532_v24 = vmul.f32 %v850_v19, %v531_v23 }
 0x283   : > { %v533_v25 = vmul.f32 %v532_v24, %v526_v17 }
 0x285   : > { %v535_v27 = vsel %vm534_vm10, %v526_v17, %v533_v25 }
 0x286   : > { %v538_v28 = vsel %vm536_vm11, %v537_v26, %v535_v27 }
 0x287   : > { %v539_v29 = vmax.f32 %v538_v28, 1e-12 }
 0x289   : > { %851 = vrcp.f32 %v539_v29  ;;  %v551_v33 = vand.u32 2147483648, %v539_v29  ;;  %v549_v35 = vand.u32 2147483647, %v539_v29  ;;  %vm545_vm13 = vweird.f32 %v539_v29 }
 0x28b   : > { %v552_v37 = vor.u32 1.1754944e-38, %v551_v33  ;;  %vm550_vm15 = vcmp.eq.f32.partialorder %v549_v35, 8.507059e+37 }
 0x28f   : > { %v852_v30 = vpop.eup %851 }
 0x290   : > { %v541_v31 = vmul.f32 %v852_v30, %v539_v29  ;;  %vm546_vm12 = vweird.f32 %v852_v30 }
 0x291   : > { %vm547_vm14 = vmor %vm545_vm13, %vm546_vm12 }
 0x292   : > { %v542_v32 = vsub.f32 1.0, %v541_v31 }
 0x294   : > { %v543_v34 = vmul.f32 %v852_v30, %v542_v32 }
 0x296   : > { %v544_v36 = vadd.f32 %v852_v30, %v543_v34 }
 0x298   : > { %v548_v38 = vsel %vm547_vm14, %v852_v30, %v544_v36 }
 0x299   : > { %v553_v39 = vsel %vm550_vm15, %v552_v37, %v548_v38 }
 0x29a   : > { %v554_v40 = vmul.f32 %v553_v39, %v1234_v11 }
 0x29c   : > { %555 = vst.msk [vmem:[%s322_s16] sm:$0x1] %vm328_vm0, %v554_v40 }
 0x29d   : > { %998 = shalt.err (!%p995_p9)
}
 0x29e   : > { %765 = dma.vmem_to_hbm [thread:$0]  (%p1173_p4), %s588_s17, 16, %s590_s29, %s562_s30  }
 0x29f PF: > { %s1322_s11 = sld [smem:[#allocation18_spill]]  ;;  %p780_p10 = pnand %p731_p6, %p1181_p7 }
 0x2a1   : > { %p781_p11 = pneg %p780_p10 }
 0x2a5   : > { %s601_s27 = sand.u32 1, %s1322_s11  }
 0x2a6   : > { %s602_s2 = scalar_lea.sflag [#allocation6], %s601_s27 }
 0x2a7   : > { %1036 = dma.done.wait (%p781_p11), %s602_s2, 128  }
 0x2a8   : > { %1038 = vsyncadd (%p781_p11), %s602_s2, 4294967168  ;;  %s612_s18 = scalar_lea.sflag [#allocation12], %s601_s27 }
 0x2a9   : > { %1040 = dma.done.wait (%p781_p11), %s612_s18, 16  }
 0x2aa   : > { %1042 = vsyncadd (%p781_p11), %s612_s18, 4294967280  ;;  %s28_s23 = sadd.s32 1, %s1065_s23   ;;  %s1324_s14 = sld [smem:[#allocation19_spill]] }
 0x2ab   : > { %p25_p12 = scmp.ge.s32.totalorder %s28_s23, 4   ;;  %s1325_s20 = sld [smem:[#allocation21_spill]] }
 0x2ac   : > { %s1326_s28 = sld [smem:[#allocation20_spill]]  ;;  %s1327_s18 = smov %s1049_s19 }
 0x2ad   : > { %s1329_s21 = smov %s1061_s22 }
 0x2ae   :  { %27 = sbr.rel (!%p25_p12) target bundleno = 12 (0xc), region = 123 }
 0x2b0   : > { %s1328_s19 = smov %s1324_s14 }
 0x2b2   : > { %s1330_s22 = smov %s1326_s28 }
 0x2b3   :  { %617 = vsyncpa [#allocation5], 1 }
 0x2b4   :  { %619 = vsyncpa [#allocation5 + $0x1], 1 }
 0x2b5   :  { %620 = vsyncpa [#allocation8], 1 }
 0x2b6   :  { %622 = vsyncpa [#allocation8 + $0x1], 1 }
 0x2b7   :  { %623 = vsyncpa [#allocation6], 1 }
 0x2b8   :  { %625 = vsyncpa [#allocation6 + $0x1], 1 }
 0x2b9   :  { %626 = vsyncpa [#allocation12], 1 }
 0x2ba   :  { %628 = vsyncpa [#allocation12 + $0x1], 1 }

</bundles_post_ra>
